<compile_context>
chip_gen: v6e
topology: v6e:2x2x1
jax: 0.10.0
libtpu: 0.0.40
codegen_flags: <defaults>
</compile_context>

<pallas_src>
import functools

import jax
import jax.numpy as jnp
from jax.experimental import pallas as pl
from jax.experimental.pallas import tpu as pltpu


def _round_up(x: int, m: int) -> int:
    return ((x + m - 1) // m) * m


def _kd_loss_kernel(student_ref, teacher_ref, targets_ref, out_ref,
                    m_s_sc, m_t_sc, ses_sc, ses1_sc, set_sc, inner_sc, stgt_sc,
                    *, inv_temperature: float, total_batch: int,
                    num_classes: int, block_rows: int, class_block: int,
                    mask_cols: bool):
    i = pl.program_id(0)                      # row tile
    k = pl.program_id(1)                      # class chunk (innermost)
    nk = pl.num_programs(1)

    s = student_ref[...].astype(jnp.float32)  # (TB, CB) upcast after DMA
    t = teacher_ref[...].astype(jnp.float32)  # (TB, CB)
    tgt = targets_ref[...]                    # (TB, 1) int32

    tb, cb = s.shape
    inv_t = jnp.float32(inv_temperature)
    neg_big = jnp.float32(-1e30)

    # Global class ids for this chunk, built lane-wise as (1, CB) and
    # broadcast against the (TB, 1) targets (no full (TB, CB) int32 tile).
    col_ids = k * class_block + jax.lax.broadcasted_iota(jnp.int32, (1, cb), 1)
    if mask_cols:
        # Partial last class chunk: push invalid lanes to a very negative
        # finite sentinel.  Same sentinel for s and t keeps (tt - ss) finite,
        # so the masked lanes contribute exactly 0 everywhere (no NaN).
        col_ok = col_ids < num_classes
        s = jnp.where(col_ok, s, neg_big)
        t = jnp.where(col_ok, t, neg_big)

    # ---- per-chunk statistics (relative to the chunk row-maxes) --------------
    # max(s/T) == max(s)/T, so one row max of raw s serves both the T-scaled
    # softmax (KL) and the plain softmax (CE).
    m_s_c = jnp.max(s, axis=1, keepdims=True)             # (TB, 1)
    m_t_c = jnp.max(t, axis=1, keepdims=True)
    ss = (s - m_s_c) * inv_t
    tt = (t - m_t_c) * inv_t
    et = jnp.exp(tt)
    ses_c = jnp.sum(jnp.exp(ss), axis=1, keepdims=True)        # sum e^{(s-m)/T}
    ses1_c = jnp.sum(jnp.exp(s - m_s_c), axis=1, keepdims=True)  # sum e^{s-m}
    set_c = jnp.sum(et, axis=1, keepdims=True)                   # sum e^{(t-m)/T}
    inner_c = jnp.sum(et * (tt - ss), axis=1, keepdims=True)
    stgt_c = jnp.sum(jnp.where(col_ids == tgt, s, 0.0),
                     axis=1, keepdims=True)                      # raw s[tgt]

    # ---- online merge into the running accumulators --------------------------
    @pl.when(k == 0)
    def _():
        m_s_sc[...] = m_s_c
        m_t_sc[...] = m_t_c
        ses_sc[...] = ses_c
        ses1_sc[...] = ses1_c
        set_sc[...] = set_c
        inner_sc[...] = inner_c
        stgt_sc[...] = stgt_c

    @pl.when(k > 0)
    def _():
        m_s_o = m_s_sc[...]
        m_t_o = m_t_sc[...]
        m_s_n = jnp.maximum(m_s_o, m_s_c)
        m_t_n = jnp.maximum(m_t_o, m_t_c)

        d_s_o = (m_s_o - m_s_n) * inv_t
        d_s_c = (m_s_c - m_s_n) * inv_t
        d_t_o = (m_t_o - m_t_n) * inv_t
        d_t_c = (m_t_c - m_t_n) * inv_t
        a_s_o = jnp.exp(d_s_o)
        a_s_c = jnp.exp(d_s_c)
        a_t_o = jnp.exp(d_t_o)
        a_t_c = jnp.exp(d_t_c)
        a1_o = jnp.exp(m_s_o - m_s_n)
        a1_c = jnp.exp(m_s_c - m_s_n)

        set_o = set_sc[...]
        ses_sc[...] = a_s_o * ses_sc[...] + a_s_c * ses_c
        ses1_sc[...] = a1_o * ses1_sc[...] + a1_c * ses1_c
        inner_sc[...] = (a_t_o * (inner_sc[...] + (d_t_o - d_s_o) * set_o)
                         + a_t_c * (inner_c + (d_t_c - d_s_c) * set_c))
        set_sc[...] = a_t_o * set_o + a_t_c * set_c
        stgt_sc[...] = stgt_sc[...] + stgt_c
        m_s_sc[...] = m_s_n
        m_t_sc[...] = m_t_n

    # ---- finalize on the last class chunk: per-row losses -> tile partials ---
    @pl.when(k == nk - 1)
    def _():
        row_ids = i * block_rows + jax.lax.broadcasted_iota(
            jnp.int32, (tb, 1), 0)
        row_ok = row_ids < total_batch       # rows past B (partial block) drop

        SES = ses_sc[...]
        SET = set_sc[...]
        # KL(row) = sum_c p_t (log p_t - log p_s) = inner/SET + logSES - logSET
        kl_row = inner_sc[...] / SET + jnp.log(SES) - jnp.log(SET)
        # CE(row) = logsumexp(s) - s[target]
        ce_row = m_s_sc[...] + jnp.log(ses1_sc[...]) - stgt_sc[...]

        # where-select (NOT multiply): garbage rows may hold NaN/Inf.
        kl_part = jnp.sum(jnp.where(row_ok, kl_row, 0.0))
        ce_part = jnp.sum(jnp.where(row_ok, ce_row, 0.0))

        sub = jax.lax.broadcasted_iota(jnp.int32, out_ref.shape, 1)
        lane = jax.lax.broadcasted_iota(jnp.int32, out_ref.shape, 2)
        out_ref[...] = jnp.where(
            (sub == 0) & (lane == 0), kl_part,
            jnp.where((sub == 0) & (lane == 1), ce_part, 0.0)
        ).astype(jnp.float32)


def knowledge_distillation_loss(student_outputs, teacher_outputs, targets,
                                temperature: float = 4.0, alpha: float = 0.7,
                                block_rows=None, class_block=None):
    """student_outputs, teacher_outputs: (B, C) float (f32 or bf16);
    targets: (B,) int."""
    b, c = student_outputs.shape

    # ---- generation-aware sizing ---------------------------------------------
    try:
        vmem_cap = int(pltpu.get_tpu_info().vmem_capacity_bytes)
    except Exception:
        vmem_cap = 64 * 1024 * 1024          # conservative (v7x-sized) fallback
    if vmem_cap >= 96 * 1024 * 1024:         # 128 MiB VMEM parts: v5e / v6e
        target_tile_bytes = 4 * 1024 * 1024
        vmem_limit = 64 * 1024 * 1024
    else:                                    # 64 MiB VMEM part: v7x
        target_tile_bytes = (3 * 1024 * 1024) // 2
        vmem_limit = 44 * 1024 * 1024

    # ---- class-dim chunking (online softmax) for very large vocabularies -----
    MAX_CLASS_BLOCK = 16 * 1024
    if class_block is None:
        class_block = c if c <= MAX_CLASS_BLOCK else MAX_CLASS_BLOCK
    class_block = int(class_block)
    num_class_chunks = int(pl.cdiv(c, class_block))
    mask_cols = (num_class_chunks * class_block) != c

    # ---- batch-dim tiling (f32-equivalent VMEM budget per input tile) --------
    if block_rows is None:
        block_rows = target_tile_bytes // (class_block * 4)
    block_rows = int(max(8, min(int(block_rows), 1024)))
    block_rows = (block_rows // 8) * 8
    # Guarantee >= 2 row tiles so both v7x TensorCores get work.
    two_tile_cap = max(8, _round_up((b + 1) // 2, 8))
    block_rows = max(8, min(block_rows, two_tile_cap))
    num_row_tiles = int(pl.cdiv(b, block_rows))

    targets2d = targets.astype(jnp.int32).reshape(b, 1)

    kernel = functools.partial(
        _kd_loss_kernel,
        inv_temperature=1.0 / float(temperature),
        total_batch=b,
        num_classes=c,
        block_rows=block_rows,
        class_block=class_block,
        mask_cols=mask_cols,
    )

    partials = pl.pallas_call(
        kernel,
        out_shape=jax.ShapeDtypeStruct((num_row_tiles, 8, 128), jnp.float32),
        grid=(num_row_tiles, num_class_chunks),
        in_specs=[
            pl.BlockSpec((block_rows, class_block), lambda i, k: (i, k)),
            pl.BlockSpec((block_rows, class_block), lambda i, k: (i, k)),
            pl.BlockSpec((block_rows, 1), lambda i, k: (i, 0)),
        ],
        out_specs=pl.BlockSpec((1, 8, 128), lambda i, k: (i, 0, 0)),
        scratch_shapes=[pltpu.VMEM((block_rows, 1), jnp.float32)] * 7,
        compiler_params=pltpu.CompilerParams(
            dimension_semantics=("parallel", "arbitrary"),
            vmem_limit_bytes=vmem_limit,
        ),
    )(student_outputs, teacher_outputs, targets2d)

    # Tiny finalize in JAX: global-batch normalization + alpha blend.
    kl_sum = jnp.sum(partials[:, 0, 0])
    ce_sum = jnp.sum(partials[:, 0, 1])
    temp = jnp.float32(temperature)
    distillation_loss = (kl_sum / b) * temp * temp
    classification_loss = ce_sum / b
    return (jnp.float32(alpha) * distillation_loss
            + jnp.float32(1.0 - alpha) * classification_loss)


def _reference(student, teacher, targets, temperature=4.0, alpha=0.7):
    # pure-JAX reference (matches the PyTorch module), f32 math
    s = student.astype(jnp.float32)
    t = teacher.astype(jnp.float32)
    T = temperature
    s_logsoft = jax.nn.log_softmax(s / T, axis=1)
    t_soft = jax.nn.softmax(t / T, axis=1)
    kl = jnp.sum(t_soft * (jnp.log(t_soft) - s_logsoft)) / s.shape[0]
    distill = kl * T * T
    ls = jax.nn.log_softmax(s, axis=1)
    ce = -jnp.mean(ls[jnp.arange(s.shape[0]), targets])
    return alpha * distill + (1 - alpha) * ce


if __name__ == "__main__":
    key = jax.random.PRNGKey(0)
    k1, k2, k3 = jax.random.split(key, 3)

    # Check 1: small canonical shape (single tile, single class chunk, f32).
    B, C = 8, 128
    student = jax.random.normal(k1, (B, C), dtype=jnp.float32)
    teacher = jax.random.normal(k2, (B, C), dtype=jnp.float32)
    targets = jax.random.randint(k3, (B,), 0, C, dtype=jnp.int32)

    loss = knowledge_distillation_loss(student, teacher, targets,
                                       temperature=4.0, alpha=0.7)
    loss = jax.block_until_ready(loss)
    ref = _reference(student, teacher, targets, temperature=4.0, alpha=0.7)
    assert jnp.allclose(loss, ref, rtol=1e-3, atol=1e-3), (loss, ref)

    # Check 2: bf16 logits, batch not divisible by the row tile (partial last
    # row block, no padding), and a chunked class axis with a partial last
    # class chunk (online-softmax merge path).
    k4, k5, k6 = jax.random.split(jax.random.PRNGKey(1), 3)
    B2, C2 = 20, 200
    student2 = jax.random.normal(k4, (B2, C2), dtype=jnp.bfloat16)
    teacher2 = jax.random.normal(k5, (B2, C2), dtype=jnp.bfloat16)
    targets2 = jax.random.randint(k6, (B2,), 0, C2, dtype=jnp.int32)

    loss2 = knowledge_distillation_loss(student2, teacher2, targets2,
                                        temperature=3.0, alpha=0.5,
                                        block_rows=8, class_block=128)
    loss2 = jax.block_until_ready(loss2)
    ref2 = _reference(student2, teacher2, targets2, temperature=3.0, alpha=0.5)
    assert jnp.allclose(loss2, ref2, rtol=1e-3, atol=1e-3), (loss2, ref2)

    print("KERNEL_OK")
</pallas_src>

<mosaic_0001>
module attributes {stable_mosaic.version = 11 : i64} {
  func.func @_kd_loss_kernel(%arg0: i32, %arg1: i32, %arg2: memref<8x128xf32, #tpu.memory_space<vmem>>, %arg3: memref<8x128xf32, #tpu.memory_space<vmem>>, %arg4: memref<8x1xi32, #tpu.memory_space<vmem>>, %arg5: memref<1x8x128xf32, #tpu.memory_space<vmem>>, %arg6: memref<8x1xf32, #tpu.memory_space<vmem>>, %arg7: memref<8x1xf32, #tpu.memory_space<vmem>>, %arg8: memref<8x1xf32, #tpu.memory_space<vmem>>, %arg9: memref<8x1xf32, #tpu.memory_space<vmem>>, %arg10: memref<8x1xf32, #tpu.memory_space<vmem>>, %arg11: memref<8x1xf32, #tpu.memory_space<vmem>>, %arg12: memref<8x1xf32, #tpu.memory_space<vmem>>) attributes {dimension_semantics = [#tpu.dimension_semantics<parallel>, #tpu.dimension_semantics<arbitrary>], iteration_bounds = array<i64: 1, 1>, scalar_prefetch = 0 : i64, scratch_operands = 7 : i64, tpu.core_type = #tpu.core_type<tc>, window_params = [{transform_indices = @transform_0, window_bounds = array<i64: 8, 128>}, {transform_indices = @transform_1, window_bounds = array<i64: 8, 128>}, {transform_indices = @transform_2, window_bounds = array<i64: 8, 1>}, {transform_indices = @transform_3, window_bounds = array<i64: 1, 8, 128>}]} {
    %c0 = arith.constant 0 : index
    %c0_0 = arith.constant 0 : index
    %0 = vector.load %arg2[%c0, %c0_0] : memref<8x128xf32, #tpu.memory_space<vmem>>, vector<8x128xf32>
    %c0_1 = arith.constant 0 : index
    %c0_2 = arith.constant 0 : index
    %1 = vector.load %arg3[%c0_1, %c0_2] : memref<8x128xf32, #tpu.memory_space<vmem>>, vector<8x128xf32>
    %c0_3 = arith.constant 0 : index
    %c0_4 = arith.constant 0 : index
    %2 = vector.load %arg4[%c0_3, %c0_4] : memref<8x1xi32, #tpu.memory_space<vmem>>, vector<8x1xi32>
    %c128_i32 = arith.constant 128 : i32
    %3 = arith.muli %arg1, %c128_i32 : i32
    %4 = tpu.iota {dimensions = array<i32: 1>} : vector<1x128xi32>
    %5 = vector.broadcast %3 : i32 to vector<1x128xi32>
    %6 = arith.addi %5, %4 : vector<1x128xi32>
    %cst = arith.constant dense<0xFF800000> : vector<8xf32>
    %7 = vector.multi_reduction <maximumf>, %0, %cst [1] : vector<8x128xf32> to vector<8xf32>
    %8 = vector.shape_cast %7 : vector<8xf32> to vector<8x1xf32>
    %cst_5 = arith.constant dense<0xFF800000> : vector<8xf32>
    %9 = vector.multi_reduction <maximumf>, %1, %cst_5 [1] : vector<8x128xf32> to vector<8xf32>
    %10 = vector.shape_cast %9 : vector<8xf32> to vector<8x1xf32>
    %11 = vector.broadcast %8 : vector<8x1xf32> to vector<8x128xf32>
    %12 = arith.subf %0, %11 : vector<8x128xf32>
    %cst_6 = arith.constant 2.500000e-01 : f32
    %13 = vector.broadcast %cst_6 : f32 to vector<8x128xf32>
    %14 = arith.mulf %12, %13 : vector<8x128xf32>
    %15 = vector.broadcast %10 : vector<8x1xf32> to vector<8x128xf32>
    %16 = arith.subf %1, %15 : vector<8x128xf32>
    %cst_7 = arith.constant 2.500000e-01 : f32
    %17 = vector.broadcast %cst_7 : f32 to vector<8x128xf32>
    %18 = arith.mulf %16, %17 : vector<8x128xf32>
    %19 = math.exp %18 : vector<8x128xf32>
    %20 = math.exp %14 : vector<8x128xf32>
    %cst_8 = arith.constant dense<0.000000e+00> : vector<8xf32>
    %21 = vector.multi_reduction <add>, %20, %cst_8 [1] : vector<8x128xf32> to vector<8xf32>
    %22 = vector.shape_cast %21 : vector<8xf32> to vector<8x1xf32>
    %23 = vector.broadcast %8 : vector<8x1xf32> to vector<8x128xf32>
    %24 = arith.subf %0, %23 : vector<8x128xf32>
    %25 = math.exp %24 : vector<8x128xf32>
    %cst_9 = arith.constant dense<0.000000e+00> : vector<8xf32>
    %26 = vector.multi_reduction <add>, %25, %cst_9 [1] : vector<8x128xf32> to vector<8xf32>
    %27 = vector.shape_cast %26 : vector<8xf32> to vector<8x1xf32>
    %cst_10 = arith.constant dense<0.000000e+00> : vector<8xf32>
    %28 = vector.multi_reduction <add>, %19, %cst_10 [1] : vector<8x128xf32> to vector<8xf32>
    %29 = vector.shape_cast %28 : vector<8xf32> to vector<8x1xf32>
    %30 = arith.subf %18, %14 : vector<8x128xf32>
    %31 = arith.mulf %19, %30 : vector<8x128xf32>
    %cst_11 = arith.constant dense<0.000000e+00> : vector<8xf32>
    %32 = vector.multi_reduction <add>, %31, %cst_11 [1] : vector<8x128xf32> to vector<8xf32>
    %33 = vector.shape_cast %32 : vector<8xf32> to vector<8x1xf32>
    %34 = vector.broadcast %6 : vector<1x128xi32> to vector<8x128xi32>
    %35 = vector.broadcast %2 : vector<8x1xi32> to vector<8x128xi32>
    %36 = arith.cmpi eq, %34, %35 : vector<8x128xi32>
    %cst_12 = arith.constant 0.000000e+00 : f32
    %37 = vector.broadcast %cst_12 : f32 to vector<8x128xf32>
    %38 = arith.select %36, %0, %37 : vector<8x128xi1>, vector<8x128xf32>
    %cst_13 = arith.constant dense<0.000000e+00> : vector<8xf32>
    %39 = vector.multi_reduction <add>, %38, %cst_13 [1] : vector<8x128xf32> to vector<8xf32>
    %40 = vector.shape_cast %39 : vector<8xf32> to vector<8x1xf32>
    %c0_i32 = arith.constant 0 : i32
    %41 = arith.cmpi eq, %arg1, %c0_i32 : i32
    %42 = arith.extui %41 : i1 to i32
    %c0_i32_14 = arith.constant 0 : i32
    %43 = arith.cmpi ne, %42, %c0_i32_14 : i32
    scf.if %43 {
      %c0_20 = arith.constant 0 : index
      %c0_21 = arith.constant 0 : index
      %50 = vector.load %arg6[%c0_20, %c0_21] : memref<8x1xf32, #tpu.memory_space<vmem>>, vector<8x1xf32>
      tpu.vector_store %arg6[%c0_20, %c0_21], %8 {strides = array<i32>} : memref<8x1xf32, #tpu.memory_space<vmem>>, vector<8x1xf32>,
      %c0_22 = arith.constant 0 : index
      %c0_23 = arith.constant 0 : index
      %51 = vector.load %arg7[%c0_22, %c0_23] : memref<8x1xf32, #tpu.memory_space<vmem>>, vector<8x1xf32>
      tpu.vector_store %arg7[%c0_22, %c0_23], %10 {strides = array<i32>} : memref<8x1xf32, #tpu.memory_space<vmem>>, vector<8x1xf32>,
      %c0_24 = arith.constant 0 : index
      %c0_25 = arith.constant 0 : index
      %52 = vector.load %arg8[%c0_24, %c0_25] : memref<8x1xf32, #tpu.memory_space<vmem>>, vector<8x1xf32>
      tpu.vector_store %arg8[%c0_24, %c0_25], %22 {strides = array<i32>} : memref<8x1xf32, #tpu.memory_space<vmem>>, vector<8x1xf32>,
      %c0_26 = arith.constant 0 : index
      %c0_27 = arith.constant 0 : index
      %53 = vector.load %arg9[%c0_26, %c0_27] : memref<8x1xf32, #tpu.memory_space<vmem>>, vector<8x1xf32>
      tpu.vector_store %arg9[%c0_26, %c0_27], %27 {strides = array<i32>} : memref<8x1xf32, #tpu.memory_space<vmem>>, vector<8x1xf32>,
      %c0_28 = arith.constant 0 : index
      %c0_29 = arith.constant 0 : index
      %54 = vector.load %arg10[%c0_28, %c0_29] : memref<8x1xf32, #tpu.memory_space<vmem>>, vector<8x1xf32>
      tpu.vector_store %arg10[%c0_28, %c0_29], %29 {strides = array<i32>} : memref<8x1xf32, #tpu.memory_space<vmem>>, vector<8x1xf32>,
      %c0_30 = arith.constant 0 : index
      %c0_31 = arith.constant 0 : index
      %55 = vector.load %arg11[%c0_30, %c0_31] : memref<8x1xf32, #tpu.memory_space<vmem>>, vector<8x1xf32>
      tpu.vector_store %arg11[%c0_30, %c0_31], %33 {strides = array<i32>} : memref<8x1xf32, #tpu.memory_space<vmem>>, vector<8x1xf32>,
      %c0_32 = arith.constant 0 : index
      %c0_33 = arith.constant 0 : index
      %56 = vector.load %arg12[%c0_32, %c0_33] : memref<8x1xf32, #tpu.memory_space<vmem>>, vector<8x1xf32>
      tpu.vector_store %arg12[%c0_32, %c0_33], %40 {strides = array<i32>} : memref<8x1xf32, #tpu.memory_space<vmem>>, vector<8x1xf32>,
    } else {
    }
    %c0_i32_15 = arith.constant 0 : i32
    %44 = arith.cmpi sgt, %arg1, %c0_i32_15 : i32
    %45 = arith.extui %44 : i1 to i32
    %cst_16 = arith.constant 2.500000e-01 : f32
    %c0_i32_17 = arith.constant 0 : i32
    %46 = arith.cmpi ne, %45, %c0_i32_17 : i32
    scf.if %46 {
      %c0_20 = arith.constant 0 : index
      %c0_21 = arith.constant 0 : index
      %50 = vector.load %arg6[%c0_20, %c0_21] : memref<8x1xf32, #tpu.memory_space<vmem>>, vector<8x1xf32>
      %c0_22 = arith.constant 0 : index
      %c0_23 = arith.constant 0 : index
      %51 = vector.load %arg7[%c0_22, %c0_23] : memref<8x1xf32, #tpu.memory_space<vmem>>, vector<8x1xf32>
      %52 = arith.maximumf %50, %8 : vector<8x1xf32>
      %53 = arith.maximumf %51, %10 : vector<8x1xf32>
      %54 = arith.subf %50, %52 : vector<8x1xf32>
      %55 = vector.broadcast %cst_16 : f32 to vector<8x1xf32>
      %56 = arith.mulf %54, %55 : vector<8x1xf32>
      %57 = arith.subf %8, %52 : vector<8x1xf32>
      %58 = vector.broadcast %cst_16 : f32 to vector<8x1xf32>
      %59 = arith.mulf %57, %58 : vector<8x1xf32>
      %60 = arith.subf %51, %53 : vector<8x1xf32>
      %61 = vector.broadcast %cst_16 : f32 to vector<8x1xf32>
      %62 = arith.mulf %60, %61 : vector<8x1xf32>
      %63 = arith.subf %10, %53 : vector<8x1xf32>
      %64 = vector.broadcast %cst_16 : f32 to vector<8x1xf32>
      %65 = arith.mulf %63, %64 : vector<8x1xf32>
      %66 = math.exp %56 : vector<8x1xf32>
      %67 = math.exp %59 : vector<8x1xf32>
      %68 = math.exp %62 : vector<8x1xf32>
      %69 = math.exp %65 : vector<8x1xf32>
      %70 = arith.subf %50, %52 : vector<8x1xf32>
      %71 = math.exp %70 : vector<8x1xf32>
      %72 = arith.subf %8, %52 : vector<8x1xf32>
      %73 = math.exp %72 : vector<8x1xf32>
      %c0_24 = arith.constant 0 : index
      %c0_25 = arith.constant 0 : index
      %74 = vector.load %arg10[%c0_24, %c0_25] : memref<8x1xf32, #tpu.memory_space<vmem>>, vector<8x1xf32>
      %c0_26 = arith.constant 0 : index
      %c0_27 = arith.constant 0 : index
      %75 = vector.load %arg8[%c0_26, %c0_27] : memref<8x1xf32, #tpu.memory_space<vmem>>, vector<8x1xf32>
      %76 = arith.mulf %66, %75 : vector<8x1xf32>
      %77 = arith.mulf %67, %22 : vector<8x1xf32>
      %78 = arith.addf %76, %77 : vector<8x1xf32>
      %c0_28 = arith.constant 0 : index
      %c0_29 = arith.constant 0 : index
      %79 = vector.load %arg8[%c0_28, %c0_29] : memref<8x1xf32, #tpu.memory_space<vmem>>, vector<8x1xf32>
      tpu.vector_store %arg8[%c0_28, %c0_29], %78 {strides = array<i32>} : memref<8x1xf32, #tpu.memory_space<vmem>>, vector<8x1xf32>,
      %c0_30 = arith.constant 0 : index
      %c0_31 = arith.constant 0 : index
      %80 = vector.load %arg9[%c0_30, %c0_31] : memref<8x1xf32, #tpu.memory_space<vmem>>, vector<8x1xf32>
      %81 = arith.mulf %71, %80 : vector<8x1xf32>
      %82 = arith.mulf %73, %27 : vector<8x1xf32>
      %83 = arith.addf %81, %82 : vector<8x1xf32>
      %c0_32 = arith.constant 0 : index
      %c0_33 = arith.constant 0 : index
      %84 = vector.load %arg9[%c0_32, %c0_33] : memref<8x1xf32, #tpu.memory_space<vmem>>, vector<8x1xf32>
      tpu.vector_store %arg9[%c0_32, %c0_33], %83 {strides = array<i32>} : memref<8x1xf32, #tpu.memory_space<vmem>>, vector<8x1xf32>,
      %c0_34 = arith.constant 0 : index
      %c0_35 = arith.constant 0 : index
      %85 = vector.load %arg11[%c0_34, %c0_35] : memref<8x1xf32, #tpu.memory_space<vmem>>, vector<8x1xf32>
      %86 = arith.subf %62, %56 : vector<8x1xf32>
      %87 = arith.mulf %86, %74 : vector<8x1xf32>
      %88 = arith.addf %85, %87 : vector<8x1xf32>
      %89 = arith.mulf %68, %88 : vector<8x1xf32>
      %90 = arith.subf %65, %59 : vector<8x1xf32>
      %91 = arith.mulf %90, %29 : vector<8x1xf32>
      %92 = arith.addf %33, %91 : vector<8x1xf32>
      %93 = arith.mulf %69, %92 : vector<8x1xf32>
      %94 = arith.addf %89, %93 : vector<8x1xf32>
      %c0_36 = arith.constant 0 : index
      %c0_37 = arith.constant 0 : index
      %95 = vector.load %arg11[%c0_36, %c0_37] : memref<8x1xf32, #tpu.memory_space<vmem>>, vector<8x1xf32>
      tpu.vector_store %arg11[%c0_36, %c0_37], %94 {strides = array<i32>} : memref<8x1xf32, #tpu.memory_space<vmem>>, vector<8x1xf32>,
      %96 = arith.mulf %68, %74 : vector<8x1xf32>
      %97 = arith.mulf %69, %29 : vector<8x1xf32>
      %98 = arith.addf %96, %97 : vector<8x1xf32>
      %c0_38 = arith.constant 0 : index
      %c0_39 = arith.constant 0 : index
      %99 = vector.load %arg10[%c0_38, %c0_39] : memref<8x1xf32, #tpu.memory_space<vmem>>, vector<8x1xf32>
      tpu.vector_store %arg10[%c0_38, %c0_39], %98 {strides = array<i32>} : memref<8x1xf32, #tpu.memory_space<vmem>>, vector<8x1xf32>,
      %c0_40 = arith.constant 0 : index
      %c0_41 = arith.constant 0 : index
      %100 = vector.load %arg12[%c0_40, %c0_41] : memref<8x1xf32, #tpu.memory_space<vmem>>, vector<8x1xf32>
      %101 = arith.addf %100, %40 : vector<8x1xf32>
      %c0_42 = arith.constant 0 : index
      %c0_43 = arith.constant 0 : index
      %102 = vector.load %arg12[%c0_42, %c0_43] : memref<8x1xf32, #tpu.memory_space<vmem>>, vector<8x1xf32>
      tpu.vector_store %arg12[%c0_42, %c0_43], %101 {strides = array<i32>} : memref<8x1xf32, #tpu.memory_space<vmem>>, vector<8x1xf32>,
      %c0_44 = arith.constant 0 : index
      %c0_45 = arith.constant 0 : index
      %103 = vector.load %arg6[%c0_44, %c0_45] : memref<8x1xf32, #tpu.memory_space<vmem>>, vector<8x1xf32>
      tpu.vector_store %arg6[%c0_44, %c0_45], %52 {strides = array<i32>} : memref<8x1xf32, #tpu.memory_space<vmem>>, vector<8x1xf32>,
      %c0_46 = arith.constant 0 : index
      %c0_47 = arith.constant 0 : index
      %104 = vector.load %arg7[%c0_46, %c0_47] : memref<8x1xf32, #tpu.memory_space<vmem>>, vector<8x1xf32>
      tpu.vector_store %arg7[%c0_46, %c0_47], %53 {strides = array<i32>} : memref<8x1xf32, #tpu.memory_space<vmem>>, vector<8x1xf32>,
    } else {
    }
    %c0_i32_18 = arith.constant 0 : i32
    %47 = arith.cmpi eq, %arg1, %c0_i32_18 : i32
    %48 = arith.extui %47 : i1 to i32
    %c0_i32_19 = arith.constant 0 : i32
    %49 = arith.cmpi ne, %48, %c0_i32_19 : i32
    scf.if %49 {
      %c8_i32 = arith.constant 8 : i32
      %50 = arith.muli %arg0, %c8_i32 : i32
      %51 = tpu.iota {dimensions = array<i32: 0>} : vector<8x1xi32>
      %52 = vector.broadcast %50 : i32 to vector<8x1xi32>
      %53 = arith.addi %52, %51 : vector<8x1xi32>
      %c8_i32_20 = arith.constant 8 : i32
      %54 = vector.broadcast %c8_i32_20 : i32 to vector<8x1xi32>
      %55 = arith.cmpi slt, %53, %54 : vector<8x1xi32>
      %c0_21 = arith.constant 0 : index
      %c0_22 = arith.constant 0 : index
      %56 = vector.load %arg8[%c0_21, %c0_22] : memref<8x1xf32, #tpu.memory_space<vmem>>, vector<8x1xf32>
      %c0_23 = arith.constant 0 : index
      %c0_24 = arith.constant 0 : index
      %57 = vector.load %arg10[%c0_23, %c0_24] : memref<8x1xf32, #tpu.memory_space<vmem>>, vector<8x1xf32>
      %c0_25 = arith.constant 0 : index
      %c0_26 = arith.constant 0 : index
      %58 = vector.load %arg11[%c0_25, %c0_26] : memref<8x1xf32, #tpu.memory_space<vmem>>, vector<8x1xf32>
      %59 = arith.divf %58, %57 : vector<8x1xf32>
      %60 = math.log %56 : vector<8x1xf32>
      %61 = arith.addf %59, %60 : vector<8x1xf32>
      %62 = math.log %57 : vector<8x1xf32>
      %63 = arith.subf %61, %62 : vector<8x1xf32>
      %c0_27 = arith.constant 0 : index
      %c0_28 = arith.constant 0 : index
      %64 = vector.load %arg6[%c0_27, %c0_28] : memref<8x1xf32, #tpu.memory_space<vmem>>, vector<8x1xf32>
      %c0_29 = arith.constant 0 : index
      %c0_30 = arith.constant 0 : index
      %65 = vector.load %arg9[%c0_29, %c0_30] : memref<8x1xf32, #tpu.memory_space<vmem>>, vector<8x1xf32>
      %66 = math.log %65 : vector<8x1xf32>
      %67 = arith.addf %64, %66 : vector<8x1xf32>
      %c0_31 = arith.constant 0 : index
      %c0_32 = arith.constant 0 : index
      %68 = vector.load %arg12[%c0_31, %c0_32] : memref<8x1xf32, #tpu.memory_space<vmem>>, vector<8x1xf32>
      %69 = arith.subf %67, %68 : vector<8x1xf32>
      %cst_33 = arith.constant 0.000000e+00 : f32
      %70 = vector.broadcast %cst_33 : f32 to vector<8x1xf32>
      %71 = arith.select %55, %63, %70 : vector<8x1xi1>, vector<8x1xf32>
      %72 = vector.shape_cast %71 : vector<8x1xf32> to vector<1x8x1xf32>
      %cst_34 = arith.constant dense<0.000000e+00> : vector<1xf32>
      %73 = vector.multi_reduction <add>, %72, %cst_34 [1, 2] : vector<1x8x1xf32> to vector<1xf32>
      %74 = vector.shape_cast %73 : vector<1xf32> to vector<1x1x1xf32>
      %75 = vector.extract %74[0, 0, 0] : f32 from vector<1x1x1xf32>
      %cst_35 = arith.constant 0.000000e+00 : f32
      %76 = vector.broadcast %cst_35 : f32 to vector<8x1xf32>
      %77 = arith.select %55, %69, %76 : vector<8x1xi1>, vector<8x1xf32>
      %78 = vector.shape_cast %77 : vector<8x1xf32> to vector<1x8x1xf32>
      %cst_36 = arith.constant dense<0.000000e+00> : vector<1xf32>
      %79 = vector.multi_reduction <add>, %78, %cst_36 [1, 2] : vector<1x8x1xf32> to vector<1xf32>
      %80 = vector.shape_cast %79 : vector<1xf32> to vector<1x1x1xf32>
      %81 = vector.extract %80[0, 0, 0] : f32 from vector<1x1x1xf32>
      %82 = tpu.iota {dimensions = array<i32: 1>} : vector<1x8x128xi32>
      %83 = tpu.iota {dimensions = array<i32: 2>} : vector<1x8x128xi32>
      %c0_i32_37 = arith.constant 0 : i32
      %84 = vector.broadcast %c0_i32_37 : i32 to vector<1x8x128xi32>
      %85 = arith.cmpi eq, %82, %84 : vector<1x8x128xi32>
      %c0_i32_38 = arith.constant 0 : i32
      %86 = vector.broadcast %c0_i32_38 : i32 to vector<1x8x128xi32>
      %87 = arith.cmpi eq, %83, %86 : vector<1x8x128xi32>
      %88 = arith.andi %85, %87 : vector<1x8x128xi1>
      %c0_i32_39 = arith.constant 0 : i32
      %89 = vector.broadcast %c0_i32_39 : i32 to vector<1x8x128xi32>
      %90 = arith.cmpi eq, %82, %89 : vector<1x8x128xi32>
      %c1_i32 = arith.constant 1 : i32
      %91 = vector.broadcast %c1_i32 : i32 to vector<1x8x128xi32>
      %92 = arith.cmpi eq, %83, %91 : vector<1x8x128xi32>
      %93 = arith.andi %90, %92 : vector<1x8x128xi1>
      %cst_40 = arith.constant 0.000000e+00 : f32
      %94 = vector.broadcast %81 : f32 to vector<1x8x128xf32>
      %95 = vector.broadcast %cst_40 : f32 to vector<1x8x128xf32>
      %96 = arith.select %93, %94, %95 : vector<1x8x128xi1>, vector<1x8x128xf32>
      %97 = vector.broadcast %75 : f32 to vector<1x8x128xf32>
      %98 = arith.select %88, %97, %96 : vector<1x8x128xi1>, vector<1x8x128xf32>
      %c0_41 = arith.constant 0 : index
      %c0_42 = arith.constant 0 : index
      %c0_43 = arith.constant 0 : index
      %99 = vector.load %arg5[%c0_41, %c0_42, %c0_43] : memref<1x8x128xf32, #tpu.memory_space<vmem>>, vector<1x8x128xf32>
      tpu.vector_store %arg5[%c0_41, %c0_42, %c0_43], %98 {strides = array<i32>} : memref<1x8x128xf32, #tpu.memory_space<vmem>>, vector<1x8x128xf32>,
    } else {
    }
    return
  }
  func.func @transform_0(%arg0: i32, %arg1: i32) -> (i32, i32) {
    %c0_i32 = arith.constant 0 : i32
    return %arg0, %arg1 : i32, i32
  }
  func.func @transform_1(%arg0: i32, %arg1: i32) -> (i32, i32) {
    %c0_i32 = arith.constant 0 : i32
    return %arg0, %arg1 : i32, i32
  }
  func.func @transform_2(%arg0: i32, %arg1: i32) -> (i32, i32) {
    %c0_i32 = arith.constant 0 : i32
    %c0_i32_0 = arith.constant 0 : i32
    return %arg0, %c0_i32 : i32, i32
  }
  func.func @transform_3(%arg0: i32, %arg1: i32) -> (i32, i32, i32) {
    %c0_i32 = arith.constant 0 : i32
    %c0_i32_0 = arith.constant 0 : i32
    %c0_i32_1 = arith.constant 0 : i32
    return %arg0, %c0_i32, %c0_i32_0 : i32, i32, i32
  }
}

</mosaic_0001>

<bundles_post_ra>
// kernel: tpu_custom_call.1
= control target key start
LH: loop header
LB: loop body
LE: loop exit
PB: predicated region body
PF: predicated region fallthrough
CT: control target
= control target key end

     0   :  { %8 = vsyncpa [#allocation10], 0  ;;  %s330_s0 = inlined_call_operand.vmem [shape: f32[8,128], index: 0, kind: input, shape index: {}]   ;;  %s331_s1 = inlined_call_operand.hbm [shape: f32[8,128], index: 1, kind: input, shape index: {}]   ;;  %s332_s2 = inlined_call_operand.vmem [shape: s32[8,1], index: 2, kind: input, shape index: {}]   ;;  %s333_s3 = inlined_call_operand.hbm [shape: f32[1,8,128], index: 3, kind: output, shape index: {}]  }
   0x1   :  { %9 = vsyncpa [#allocation11], 0  ;;  %s280_s12 = smov [#allocation9]  }
   0x2   :  { %s18_s13 = sshll.u32 %s280_s12, 4  ;;  %s19_s13 = int_to_ptr.vmem [resolvable:$true] %s18_s13 }
   0x3   :  { %s244_s14 = scalar_lea.vmem %s19_s13, 128  ;;  %p249_p1 = scmp.lt.s32.totalorder %s19_s13, %s19_s13 }
   0x4   :  { %p245_p0 = scmp.ne.s32.totalorder %s19_s13, %s244_s14  ;;  %p250_p2 = scmp.lt.s32.totalorder %s244_s14, %s244_s14 }
   0x6   :  { %p251_p3 = por %p250_p2, %p249_p1 }
   0x8   :  { %p252_p4 = pnand %p251_p3, %p245_p0 }
   0xa   :  { %255 = shalt.err (!%p252_p4)
}
   0xb   :  { %21 = dma.hbm_to_vmem [thread:$0]  %s331_s1, 128, %s19_s13, [#allocation10]  }
   0xc   :  { %276 = dma.done.wait [#allocation10], 128  }
   0xd   :  { %277 = vsyncadd [#allocation10], 4294967168  ;;  %v281_v0 = vmov 0   ;;  %v27_v1 = vld [vmem:[%s330_s0] sm:$0xff]  ;;  %v28_v3 = vld [vmem:[#allocation9] sm:$0xff]  ;;  %vm70_vm0 = vcmask 7168   ;;  %v31_v14 = vlaneseq }
   0xe   :  { %220 = vset.pattern.permute.xlu1 %v281_v0  ;;  %221 = vset.pattern.permute.xlu0 %v281_v0  ;;  %v29_v2 = vld [vmem:[%s332_s2] sm:$0xff]  ;;  %s282_s1 = smov [#allocation12]  }
   0xf   :  { %35 = vmax.xlane.f32.xlu0 %v27_v1  ;;  %60 = vperm.xlu1 %220, %v29_v2   ;;  %v314_v16 = vand.u32 127, %v31_v14  ;;  %v143_v61 = vshrl.u32 %v31_v14, 7  ;;  %s204_s2 = sshll.u32 %s282_s1, 4  ;;  %s205_s2 = int_to_ptr.vmem [resolvable:$true] %s204_s2 }
  0x10   :  { %s256_s22 = scalar_lea.vmem %s205_s2, 128  ;;  %p261_p6 = scmp.lt.s32.totalorder %s205_s2, %s205_s2 }
  0x11   :  { %vm188_vm2 = vcmp.eq.s32.totalorder %v143_v61, 0  ;;  %vm191_vm3 = vcmp.eq.s32.totalorder %v314_v16, 1  ;;  %vm189_vm4 = vcmp.eq.s32.totalorder %v314_v16, 0  ;;  %p257_p5 = scmp.ne.s32.totalorder %s205_s2, %s256_s22  ;;  %p262_p7 = scmp.lt.s32.totalorder %s256_s22, %s256_s22 }
  0x12   :  { %vm192_vm5 = vmand %vm188_vm2, %vm191_vm3 }
  0x13   :  { %37 = vmax.xlane.f32.xlu0 %v28_v3  ;;  %vm190_vm6 = vmand %vm188_vm2, %vm189_vm4  ;;  %p263_p8 = por %p262_p7, %p261_p6 }
  0x15   :  { %p264_p9 = pnand %p263_p8, %p257_p5 }
  0x8a   :  { %v61_v18 = vpop.permute.xlu1 %60 }
  0x8b   :  { %vm62_vm1 = vcmp.eq.s32.totalorder %v314_v16, %v61_v18 }
  0x8c   :  { %v63_v21 = vsel %vm62_vm1, %v27_v1, 0.0 }
  0x98   :  { %v36_v4 = vpop.xlane.xlu0 %35 }
  0x99   :  { %v39_v5 = vsub.f32 %v27_v1, %v36_v4  ;;  %71 = vst.msk [vmem:[#allocation2] sm:$0xff] %vm70_vm0, %v36_v4 }
  0x9b   :  { %v40_v6 = vmul.f32 0.25, %v39_v5  ;;  %v49_v7 = vmul.f32 1.442695, %v39_v5 }
  0x9c   :  { %v38_v8 = vpop.xlane.xlu0 %37 }
  0x9d   :  { %v45_v9 = vmul.f32 1.442695, %v40_v6  ;;  %222 = vpow2.f32 %v49_v7  ;;  %v41_v10 = vsub.f32 %v28_v3, %v38_v8 }
  0x9f   :  { %224 = vpow2.f32 %v45_v9  ;;  %v42_v11 = vmul.f32 0.25, %v41_v10 }
  0xa0   :  { %v158_v38 = vld [vmem:[#allocation2] sm:$0xff] }
  0xa1   :  { %v43_v12 = vmul.f32 1.442695, %v42_v11  ;;  %v55_v19 = vsub.f32 %v42_v11, %v40_v6 }
  0xa3   :  { %226 = vpow2.f32 %v43_v12 }
  0xaa   :  { %v223_v13 = vpop.eup %222 }
  0xab   :  { %51 = vadd.xlane.f32.xlu0 %v223_v13 }
  0xac   :  { %v225_v15 = vpop.eup %224 }
  0xad   :  { %47 = vadd.xlane.f32.xlu1 %v225_v15 }
  0xb0   :  { %v227_v17 = vpop.eup %226 }
  0xb1   :  { %53 = vadd.xlane.f32.xlu0 %v227_v17  ;;  %v56_v20 = vmul.f32 %v227_v17, %v55_v19 }
  0xb5   :  { %57 = vadd.xlane.f32.xlu0 %v56_v20 }
  0xb9   :  { %64 = vadd.xlane.f32.xlu0 %v63_v21 }
 0x134   :  { %v52_v22 = vpop.xlane.xlu0 %51 }
 0x135   :  { %74 = vst.msk [vmem:[#allocation5] sm:$0xff] %vm70_vm0, %v52_v22 }
 0x136   :  { %v48_v23 = vpop.xlane.xlu1 %47 }
 0x137   :  { %73 = vst.msk [vmem:[#allocation4] sm:$0xff] %vm70_vm0, %v48_v23 }
 0x13a   :  { %v54_v24 = vpop.xlane.xlu0 %53 }
 0x13b   :  { %75 = vst.msk [vmem:[#allocation6] sm:$0xff] %vm70_vm0, %v54_v24 }
 0x13c   :  { %v159_v25 = vld [vmem:[#allocation5] sm:$0xff] }
 0x13d   :  { %228 = vlog2.f32 %v159_v25 }
 0x13e   :  { %v58_v26 = vpop.xlane.xlu0 %57  ;;  %v147_v27 = vld [vmem:[#allocation4] sm:$0xff] }
 0x13f   :  { %76 = vst.msk [vmem:[#allocation7] sm:$0xff] %vm70_vm0, %v58_v26  ;;  %230 = vlog2.f32 %v147_v27 }
 0x142   :  { %v65_v28 = vpop.xlane.xlu0 %64  ;;  %v148_v29 = vld [vmem:[#allocation6] sm:$0xff] }
 0x143   :  { %77 = vst.msk [vmem:[#allocation8] sm:$0xff] %vm70_vm0, %v65_v28  ;;  %232 = vrcp.f32 %v148_v29 }
 0x144   :  { %234 = vlog2.f32 %v148_v29 }
 0x146   :  { %v149_v34 = vld [vmem:[#allocation7] sm:$0xff] }
 0x14a   :  { %v229_v30 = vpop.eup %228  ;;  %v163_v42 = vld [vmem:[#allocation8] sm:$0xff] }
 0x14b   :  { %v161_v32 = vmul.f32 0.6931472, %v229_v30 }
 0x14c   :  { %v231_v31 = vpop.eup %230 }
 0x14d   :  { %v153_v37 = vmul.f32 0.6931472, %v231_v31  ;;  %v162_v41 = vadd.f32 %v161_v32, %v158_v38 }
 0x14f   :  { %v164_v45 = vsub.f32 %v162_v41, %v163_v42 }
 0x150   :  { %v233_v33 = vpop.eup %232 }
 0x151   :  { %v235_v35 = vpop.eup %234  ;;  %v151_v36 = vmul.f32 %v233_v33, %v149_v34  ;;  %v178_v46 = vsel %vm70_vm0, %v164_v45, 0.0 }
 0x152   :  { %v156_v40 = vmul.f32 0.6931472, %v235_v35 }
 0x153   :  { %v154_v39 = vadd.f32 %v153_v37, %v151_v36 }
 0x155   :  { %v157_v43 = vsub.f32 %v154_v39, %v156_v40 }
 0x157   :  { %v167_v44 = vsel %vm70_vm0, %v157_v43, 0.0 }
 0x158   :  { %168 = vadd.xlane.f32.xlu0 %v167_v44 }
 0x15c   :  { %179 = vadd.xlane.f32.xlu0 %v178_v46 }
 0x1e1   :  { %v169_v47 = vpop.xlane.xlu0 %168 }
 0x1e2   :  { %v170_v48 = vrot.slane %v169_v47, 4 }
 0x1e4   :  { %v171_v49 = vadd.f32 %v170_v48, %v169_v47 }
 0x1e5   :  { %v180_v50 = vpop.xlane.xlu0 %179 }
 0x1e6   :  { %v172_v51 = vrot.slane %v171_v49, 2  ;;  %v181_v52 = vrot.slane %v180_v50, 4 }
 0x1e8   :  { %v182_v53 = vadd.f32 %v181_v52, %v180_v50  ;;  %v173_v54 = vadd.f32 %v172_v51, %v171_v49 }
 0x1ea   :  { %v183_v55 = vrot.slane %v182_v53, 2  ;;  %v174_v56 = vrot.slane %v173_v54, 1 }
 0x1ec   :  { %v184_v57 = vadd.f32 %v183_v55, %v182_v53  ;;  %v175_v58 = vadd.f32 %v174_v56, %v173_v54 }
 0x1ee   :  { %213 = vpush %v175_v58  ;;  %v185_v59 = vrot.slane %v184_v57, 1 }
 0x1f0   :  { %v186_v60 = vadd.f32 %v185_v59, %v184_v57 }
 0x1f2   :  { %215 = vpush %v186_v60 }
 0x21f   :  { %s214_s0 = spop %213 }
 0x220   :  { %v195_v63 = vstv %s214_s0 }
 0x223   :  { %s216_s21 = spop %215 }
 0x224   :  { %v193_v62 = vstv %s216_s21 }
 0x225   :  { %v194_v0 = vsel %vm192_vm5, %v193_v62, 0.0 }
 0x226   :  { %v196_v1 = vsel %vm190_vm6, %v195_v63, %v194_v0 }
 0x227   :  { %197 = vst [vmem:[#allocation12] sm:$0xff] %v196_v1 }
 0x228   :  { %267 = shalt.err (!%p264_p9)
}
 0x229   :  { %207 = dma.vmem_to_hbm [thread:$0]  %s205_s2, 128, %s333_s3, [#allocation11]  }
 0x22a   :  { %278 = dma.done.wait [#allocation11], 128  }
 0x22b   :  { %279 = vsyncadd [#allocation11], 4294967168 }
 0x22c   :  { %211 = vsyncpa [#allocation10], 1 }
 0x22d   :  { %212 = vsyncpa [#allocation11], 1 }

</bundles_post_ra>
